<compile_context>
chip_gen: v7x
topology: tpu7x:2x2x1
jax: 0.10.0
libtpu: 0.0.40
codegen_flags: <defaults>
</compile_context>

<pallas_src>
import functools

import jax
import jax.numpy as jnp
from jax import lax
from jax.experimental import pallas as pl
from jax.experimental.pallas import tpu as pltpu


def _round_up(a, m):
    return ((a + m - 1) // m) * m


def _cdiv(a, b):
    return (a + b - 1) // b


def _patch_embed_kernel(p_ref, w_ref, b_ref, o_ref):
    # p_ref: [Kp, TN] bf16   w_ref: [C_out, Kp] bf16   b_ref: [C_out, 1] f32
    # o_ref: [C_out, TN]     (TN on the lane axis -> dense stores)
    acc = jnp.dot(w_ref[...], p_ref[...], preferred_element_type=jnp.float32)
    o_ref[...] = (acc + b_ref[...]).astype(o_ref.dtype)


def _vmem_budget_bytes():
    # ~1/3 of physical VMEM as tile budget (v7x: 64 MiB -> ~21 MiB,
    # v5e/v6e: 128 MiB -> ~42 MiB); conservative fallback if the query fails.
    try:
        cap = int(pltpu.get_tpu_info().vmem_capacity_bytes)
    except Exception:  # pragma: no cover - non-TPU / old jax fallback
        cap = 64 * 1024 * 1024
    budget = cap // 3
    limit = min(cap * 3 // 4, 112 * 1024 * 1024)
    return budget, limit


def _choose_tn(n, kp, c_out, out_bytes, budget, min_steps):
    """Column-tile (lane) size: biggest balanced tile that fits the VMEM budget."""
    kp_sub = _round_up(kp, 16)                      # bf16 (16,128) VMEM tiling
    co_sub = _round_up(c_out, 8)
    per_col = 2 * kp_sub * 2 + 2 * co_sub * out_bytes          # dbl-buffered in + out
    resident = co_sub * _round_up(kp, 128) * 2 + co_sub * 128 * 4  # weight+bias (1 buffer)
    cap_cols = max(128, (budget - resident) // per_col)
    if n <= cap_cols and min_steps <= 1:
        return n                                    # whole image in one tile
    steps = max(min_steps, _cdiv(n, cap_cols))
    tn = _round_up(_cdiv(n, steps), 128)            # balanced, lane-dense tiles
    return min(tn, n)


def overlapping_patch_embed(x, weight, bias, stride=2, out_dtype=None):
    """x: [B, C_in, H, W] (NCHW, PyTorch layout); weight: [C_out, C_in, k, k]; bias: [C_out].

    Returns [B, C_out, Ho, Wo] (NCHW), matching
    nn.Conv2d(dim_in, dim_out, kernel_size=2*stride-1, stride=stride, padding=k//2).
    """
    B, C_in, H, W = x.shape
    C_out = weight.shape[0]
    k = 2 * stride - 1
    pad = k // 2
    Ho = (H + 2 * pad - k) // stride + 1
    Wo = (W + 2 * pad - k) // stride + 1
    N = Ho * Wo
    Kdim = k * k * C_in
    out_dtype = x.dtype if out_dtype is None else out_dtype
    out_bytes = jnp.dtype(out_dtype).itemsize

    # --- compact, NCHW-ordered im2col (contraction order (c, kh, kw)) ------------
    # No NCHW->NHWC transpose of x, and no K padding to 128: Kdim is only rounded
    # to the bf16 sublane tile (16) which costs no extra HBM bytes.
    xp = jnp.pad(x.astype(jnp.bfloat16), ((0, 0), (0, 0), (pad, pad), (pad, pad)))
    slices = []
    for kh in range(k):
        for kw in range(k):
            slices.append(
                xp[:, :, kh:kh + stride * (Ho - 1) + 1:stride,
                         kw:kw + stride * (Wo - 1) + 1:stride])      # [B, C_in, Ho, Wo]
    cols = jnp.stack(slices, axis=2)                                 # [B, C_in, k*k, Ho, Wo]
    cols = cols.reshape(B, Kdim, N)                                  # [B, Kdim, Ho*Wo] bf16

    Kp = _round_up(Kdim, 16)
    if Kp != Kdim:
        cols = jnp.pad(cols, ((0, 0), (0, Kp - Kdim), (0, 0)))

    # weight OIHW -> [C_out, Kdim] in the same (c, kh, kw) order, bf16; bias in f32.
    w2 = weight.reshape(C_out, Kdim).astype(jnp.bfloat16)
    if Kp != Kdim:
        w2 = jnp.pad(w2, ((0, 0), (0, Kp - Kdim)))
    b2 = bias.astype(jnp.float32).reshape(C_out, 1)

    budget, vmem_limit = _vmem_budget_bytes()
    min_steps = 2 if (B == 1 and N >= 256) else 1   # keep both v7x TensorCores busy
    TN = _choose_tn(N, Kp, C_out, out_bytes, budget, min_steps)
    grid = (B, _cdiv(N, TN))

    cost = pl.CostEstimate(
        flops=2 * B * C_out * Kp * N,
        transcendentals=0,
        bytes_accessed=B * Kp * N * 2 + C_out * Kp * 2 + C_out * 4
                       + B * C_out * N * out_bytes,
    )

    out = pl.pallas_call(
        _patch_embed_kernel,
        out_shape=jax.ShapeDtypeStruct((B, C_out, N), out_dtype),
        grid=grid,
        in_specs=[
            pl.BlockSpec((None, Kp, TN), lambda b, j: (b, 0, j)),
            # weight / bias never change across the grid -> single buffer (no 2x VMEM).
            pl.BlockSpec((C_out, Kp), lambda b, j: (0, 0),
                         pipeline_mode=pl.Buffered(1)),
            pl.BlockSpec((C_out, 1), lambda b, j: (0, 0),
                         pipeline_mode=pl.Buffered(1)),
        ],
        out_specs=pl.BlockSpec((None, C_out, TN), lambda b, j: (b, 0, j)),
        compiler_params=pltpu.CompilerParams(
            dimension_semantics=("parallel", "parallel"),
            vmem_limit_bytes=int(vmem_limit),
        ),
        cost_estimate=cost,
    )(cols, w2, b2)

    # (B, C_out, Ho*Wo) -> (B, C_out, Ho, Wo): a reshape, NOT a transpose pass.
    return out.reshape(B, C_out, Ho, Wo)


if __name__ == "__main__":
    # Deterministic synthetic setup (no checkpoint loading).
    B, C_in, H, W = 2, 4, 16, 16
    C_out, stride = 32, 2
    k = 2 * stride - 1

    key = jax.random.PRNGKey(0)
    kx, kw_, kb = jax.random.split(key, 3)
    x = jax.random.normal(kx, (B, C_in, H, W), dtype=jnp.float32)
    fan_in = C_in * k * k
    bound = 1.0 / (fan_in ** 0.5)
    weight = jax.random.uniform(kw_, (C_out, C_in, k, k), jnp.float32, -bound, bound)
    bias = jax.random.uniform(kb, (C_out,), jnp.float32, -bound, bound)

    fn = jax.jit(functools.partial(overlapping_patch_embed, stride=stride))
    out = jax.block_until_ready(fn(x, weight, bias))
    assert out.shape == (B, C_out, H // stride, W // stride)

    # Reference 1: same bf16-rounded inputs through XLA's conv -> tight check of the
    # im2col / matmul / bias wiring.
    xq = x.astype(jnp.bfloat16).astype(jnp.float32)
    wq = weight.astype(jnp.bfloat16).astype(jnp.float32)
    ref_q = lax.conv_general_dilated(
        xq, wq, window_strides=(stride, stride),
        padding=((k // 2, k // 2), (k // 2, k // 2)),
        dimension_numbers=("NCHW", "OIHW", "NCHW"),
    ) + bias.reshape(1, C_out, 1, 1)
    assert jnp.allclose(out, ref_q, atol=2e-3, rtol=2e-3)

    # Reference 2: full-f32 conv -> loose check (kernel uses bf16 MXU inputs with f32 acc).
    ref = lax.conv_general_dilated(
        x, weight, window_strides=(stride, stride),
        padding=((k // 2, k // 2), (k // 2, k // 2)),
        dimension_numbers=("NCHW", "OIHW", "NCHW"),
    ) + bias.reshape(1, C_out, 1, 1)
    assert jnp.allclose(out, ref, atol=5e-2, rtol=5e-2)

    # Optional bf16-output path (halves the largest HBM write stream).
    fn_bf16 = jax.jit(functools.partial(overlapping_patch_embed, stride=stride,
                                        out_dtype=jnp.bfloat16))
    out_bf16 = jax.block_until_ready(fn_bf16(x, weight, bias))
    assert out_bf16.dtype == jnp.bfloat16
    assert jnp.allclose(out_bf16.astype(jnp.float32), ref_q, atol=3e-2, rtol=3e-2)

    print("KERNEL_OK")
</pallas_src>

<mosaic_0001>
module attributes {stable_mosaic.version = 11 : i64} {
  func.func @_patch_embed_kernel(%arg0: i32, %arg1: i32, %arg2: memref<1x48x64xbf16, #tpu.memory_space<vmem>>, %arg3: memref<32x48xbf16, #tpu.memory_space<vmem>>, %arg4: memref<32x1xf32, #tpu.memory_space<vmem>>, %arg5: memref<1x32x64xf32, #tpu.memory_space<vmem>>) attributes {dimension_semantics = [#tpu.dimension_semantics<parallel>, #tpu.dimension_semantics<parallel>], iteration_bounds = array<i64: 2, 1>, scalar_prefetch = 0 : i64, scratch_operands = 0 : i64, tpu.core_type = #tpu.core_type<tc>, window_params = [{transform_indices = @transform_0, window_bounds = array<i64: 1, 48, 64>}, {pipeline_mode = #tpu.pipeline_mode<synchronous>, transform_indices = @transform_1, window_bounds = array<i64: 32, 48>}, {pipeline_mode = #tpu.pipeline_mode<synchronous>, transform_indices = @transform_2, window_bounds = array<i64: 32, 1>}, {transform_indices = @transform_3, window_bounds = array<i64: 1, 32, 64>}]} {
    %c0 = arith.constant 0 : index
    %c0_0 = arith.constant 0 : index
    %0 = vector.load %arg3[%c0, %c0_0] : memref<32x48xbf16, #tpu.memory_space<vmem>>, vector<32x48xbf16>
    %c0_1 = arith.constant 0 : index
    %c0_2 = arith.constant 0 : index
    %c0_3 = arith.constant 0 : index
    %1 = vector.load %arg2[%c0_1, %c0_2, %c0_3] : memref<1x48x64xbf16, #tpu.memory_space<vmem>>, vector<1x48x64xbf16>
    %2 = vector.shape_cast %1 : vector<1x48x64xbf16> to vector<48x64xbf16>
    %cst = arith.constant dense<0.000000e+00> : vector<32x64xf32>
    %3 = tpu.matmul %0, %2, %cst {dimension_numbers = #tpu.dot_dimension_numbers<[1], [0], [0], [1], [0, 0, 1, 1], [], []>} : vector<32x48xbf16>, vector<48x64xbf16>, vector<32x64xf32> -> vector<32x64xf32>
    %c0_4 = arith.constant 0 : index
    %c0_5 = arith.constant 0 : index
    %4 = vector.load %arg4[%c0_4, %c0_5] : memref<32x1xf32, #tpu.memory_space<vmem>>, vector<32x1xf32>
    %5 = vector.broadcast %4 : vector<32x1xf32> to vector<32x64xf32>
    %6 = arith.addf %3, %5 : vector<32x64xf32>
    %c0_6 = arith.constant 0 : index
    %c0_7 = arith.constant 0 : index
    %c0_8 = arith.constant 0 : index
    %7 = vector.load %arg5[%c0_6, %c0_7, %c0_8] : memref<1x32x64xf32, #tpu.memory_space<vmem>>, vector<1x32x64xf32>
    %8 = vector.shape_cast %7 : vector<1x32x64xf32> to vector<32x64xf32>
    %9 = vector.shape_cast %6 : vector<32x64xf32> to vector<1x32x64xf32>
    tpu.vector_store %arg5[%c0_6, %c0_7, %c0_8], %9 {strides = array<i32>} : memref<1x32x64xf32, #tpu.memory_space<vmem>>, vector<1x32x64xf32>,
    return
  }
  func.func @transform_0(%arg0: i32, %arg1: i32) -> (i32, i32, i32) {
    %c0_i32 = arith.constant 0 : i32
    %c0_i32_0 = arith.constant 0 : i32
    return %arg0, %c0_i32, %arg1 : i32, i32, i32
  }
  func.func @transform_1(%arg0: i32, %arg1: i32) -> (i32, i32) {
    %c0_i32 = arith.constant 0 : i32
    %c0_i32_0 = arith.constant 0 : i32
    %c0_i32_1 = arith.constant 0 : i32
    return %c0_i32, %c0_i32_0 : i32, i32
  }
  func.func @transform_2(%arg0: i32, %arg1: i32) -> (i32, i32) {
    %c0_i32 = arith.constant 0 : i32
    %c0_i32_0 = arith.constant 0 : i32
    %c0_i32_1 = arith.constant 0 : i32
    return %c0_i32, %c0_i32_0 : i32, i32
  }
  func.func @transform_3(%arg0: i32, %arg1: i32) -> (i32, i32, i32) {
    %c0_i32 = arith.constant 0 : i32
    %c0_i32_0 = arith.constant 0 : i32
    return %arg0, %c0_i32, %arg1 : i32, i32, i32
  }
}

</mosaic_0001>

<bundles_post_ra>
// kernel: overlapping_patch_embed.1
= control target key start
LH: loop header
LB: loop body
LE: loop exit
PB: predicated region body
PF: predicated region fallthrough
CT: control target
= control target key end

     0   :  { %s520_s12 = smov 0   ;;  %s522_s13 = smov 0   ;;  %s577_s0 = inlined_call_operand.vmem [shape: bf16[2,48,64], index: 0, kind: input, shape index: {}]   ;;  %s578_s1 = inlined_call_operand.vmem [shape: bf16[32,48], index: 1, kind: input, shape index: {}]   ;;  %s579_s2 = inlined_call_operand.vmem [shape: f32[32,1], index: 2, kind: input, shape index: {}]   ;;  %s580_s3 = inlined_call_operand.vmem [shape: f32[2,32,64], index: 3, kind: output, shape index: {}]  }
   0x1   :  { %s524_s14 = smov 0  }
   0x2 LB: > { %s25_s15 = sadd.s32 1, %s493_s13  ;;  %p413_p0 = scmp.ge.s32.totalorder %s497_s14, 1  ;;  %s497_s14 = sphi %s524_s14, %s13_s14   ;;  %s493_s13 = sphi %s522_s13, %s582_s13   ;;  %s489_s12 = sphi %s520_s12, %s581_s12  }
   0x3   : > { %p27_p1 = scmp.ge.s32.totalorder %s25_s15, 2  ;;  %p156_p2 = scmp.lt.s32.totalorder %s497_s14, 3 }
   0x5   : > { %s584_s15 = smov (%p27_p1, %s25_s15), 0  ;;  %p157_p3 = pnand %p413_p0, %p156_p2 }
   0x6   : > { %p186_p4 = scmp.lt.s32.totalorder (!%p157_p3), %s489_s12, 1  ;;  %v473_v0 = vld [vmem:[%s578_s1] sm:$0xff] (!%p157_p3)   ;;  %vm265_vm0 = vcmask (!%p157_p3), 392192   ;;  %v215_v1 = vld [vmem:[%s579_s2 + $0x10] sm:$0xff] (!%p157_p3)  ;;  %v499_v3 = vmov (!%p157_p3), 0   ;;  %v216_v4 = vld [vmem:[%s579_s2 + $0x18] sm:$0xff] (!%p157_p3) }
   0x7   : > { %160 = sbr.rel (%p157_p3) target bundleno = 249 (0xf9), region = 32  ;;  %438 = vmatprep.mubr.msk.bf16.mxu0 (!%p157_p3), %vm265_vm0, %v473_v0  ;;  %v213_v2 = vld [vmem:[%s579_s2] sm:$0xff] (!%p157_p3)  ;;  %469 = vset.pattern.permute.xlu1 (!%p157_p3), %v499_v3  ;;  %v214_v5 = vld [vmem:[%s579_s2 + $0x8] sm:$0xff] (!%p157_p3)  ;;  %vm321_vm1 = vcmask (!%p157_p3), 523264  }
   0x8   : > { %468 = vset.pattern.permute.xlu0 (!%p157_p3), %v499_v3  ;;  %229 = vperm.xlu1 (!%p157_p3), %469, %v215_v1   ;;  %v474_v9 = vld [vmem:[%s578_s1 + $0x8] sm:$0xff] (!%p157_p3)  }
   0x9   : > { %219 = vperm.xlu0 (!%p157_p3), %468, %v213_v2  }
   0xc   : > { %234 = vperm.xlu1 (!%p157_p3), %469, %v216_v4  }
   0xd   : > { %224 = vperm.xlu0 (!%p157_p3), %468, %v214_v5  }
   0xe   : > { %s586_s12 = smov (!%p186_p4, %s489_s12), 1 }
   0xf   : > { %s442_s22 = smul.u32 24, %s586_s12  ;;  %s426_s5 = sshll.u32 %s586_s12, 5 }
  0x10   : > { %s201_s8 = scalar_lea.vmem %s580_s3, %s426_s5 }
  0x11   : > { %s193_s29 = scalar_lea.vmem %s577_s0, %s442_s22 }
  0x12   : > { %v470_v6 = vld [vmem:[%s193_s29] sm:$0xff]   ;;  %v471_v7 = vld [vmem:[%s193_s29 + $0x8] sm:$0xff]   ;;  %v472_v8 = vld [vmem:[%s193_s29 + $0x10] sm:$0xff]  }
  0x13   : > { %432 = vmatprep.subr.bf16.mxu0 %v470_v6 }
  0x14   : > { %433 = vmatpush3.bf16.msra.mxu0 %v470_v6 }
  0x15   : > { %434 = vmatprep.subr.bf16.mxu0 %v471_v7 }
  0x18   : > { %435 = vmatpush3.bf16.msra.mxu0 %v471_v7 }
  0x19   : > { %436 = vmatprep.subr.bf16.mxu0 %v472_v8 }
  0x1c   : > { %437 = vmatpush3.bf16.msra.mxu0 %v472_v8 }
  0x1f   : > { %439 = vmatmul.mubr.msk.bf16.vlgmr.msra.gmra.mrb[0].mxu0 %vm265_vm0, %v474_v9 }
  0x87   : > { %v230_v10 = vpop.permute.xlu1 %229 }
  0x88   : > { %v220_v11 = vpop.permute.xlu0 %219 }
  0x8b   : > { %v235_v15 = vpop.permute.xlu1 %234 }
  0x8c   : > { %v225_v18 = vpop.permute.xlu0 %224 }
  0xf2   : > { %v440_v12 = vpop.f32.mrb[0].mxu0 }
  0xf3   : > { %v315_v13 = vadd.f32 %v440_v12, %v230_v10  ;;  %v306_v14 = vpop.f32.mrb[1].mxu0 }
  0xf4   : > { %v307_v16 = vadd.f32 %v306_v14, %v220_v11  ;;  %v441_v17 = vpop.f32.mrb[2].mxu0 }
  0xf5   : > { %324 = vst.msk [vmem:[%s201_s8 + $0x10] sm:$0xff] %vm321_vm1, %v315_v13  ;;  %v318_v19 = vadd.f32 %v441_v17, %v235_v15  ;;  %v309_v20 = vpop.f32.mrb[3].mxu0 }
  0xf6   : > { %322 = vst.msk [vmem:[%s201_s8] sm:$0xff] %vm321_vm1, %v307_v16  ;;  %v310_v21 = vadd.f32 %v309_v20, %v225_v18 }
  0xf7   : > { %325 = vst.msk [vmem:[%s201_s8 + $0x18] sm:$0xff] %vm321_vm1, %v318_v19 }
  0xf8   : > { %323 = vst.msk [vmem:[%s201_s8 + $0x8] sm:$0xff] %vm321_vm1, %v310_v21 }
  0xf9 PF: > { %s13_s14 = sadd.s32 1, %s497_s14   ;;  %s581_s12 = smov %s493_s13 }
  0xfa   : > { %p10_p5 = scmp.ge.s32.totalorder %s13_s14, 4   ;;  %s582_s13 = smov %s584_s15 }
  0xfc   :  { %12 = sbr.rel (!%p10_p5) target bundleno = 2 (0x2), region = 62 }

</bundles_post_ra>
